<compile_context>
chip_gen: v7x
topology: tpu7x:2x2x1
jax: 0.10.0
libtpu: 0.0.40
codegen_flags: <defaults>
</compile_context>

<pallas_src>
import jax
import jax.numpy as jnp
from jax.experimental import pallas as pl
from jax.experimental.pallas import tpu as pltpu

FOLD = 8  # original rows packed along the lane axis per folded row


def _round_up(a, b):
    return ((a + b - 1) // b) * b


def _sublane_multiple(dtype):
    # Min second-to-last block-dim multiple: 8 for 32-bit, 16 for 16-bit, 32 for 8-bit.
    return max(8, 32 // jnp.dtype(dtype).itemsize)


def _folded_linear_kernel(x_ref, w_ref, b_ref, o_ref):
    # x_ref: (TMF, FOLD*in_dim)            -- FOLD original rows per folded row
    # w_ref: (FOLD*in_dim, FOLD*out_dim)   -- block-diagonal kron(I, W^T), VMEM-resident
    # b_ref: (1, FOLD*out_dim)             -- bias tiled FOLD times, VMEM-resident
    # o_ref: (TMF, FOLD*out_dim)           -- lane-dense output tile
    acc = jnp.dot(x_ref[...], w_ref[...], preferred_element_type=jnp.float32)
    o_ref[...] = (acc + b_ref[...].astype(jnp.float32)).astype(o_ref.dtype)


def fold_linear_params(weight, bias):
    """Precompute (once per weight -- hoist out of the per-call hot path).

    weight: (out_dim, in_dim) PyTorch convention; bias: (out_dim,)
    returns w_fold (FOLD*in_dim, FOLD*out_dim) = kron(I_FOLD, W^T),
            b_fold (1, FOLD*out_dim).
    """
    out_dim = weight.shape[0]
    w_fold = jnp.kron(jnp.eye(FOLD, dtype=weight.dtype), weight.T)
    b_fold = jnp.tile(bias, FOLD).reshape(1, FOLD * out_dim)
    return w_fold, b_fold


def downsampler_forward_folded(x, w_fold, b_fold, *, block_rows_folded=2048):
    """Linear over the last axis using pre-folded params.

    x: (..., in_dim); w_fold: (FOLD*in_dim, FOLD*out_dim); b_fold: (1, FOLD*out_dim)
    returns (..., out_dim).
    """
    in_dim = x.shape[-1]
    assert w_fold.shape[0] == FOLD * in_dim, "w_fold does not match x's last dim"
    out_dim = w_fold.shape[1] // FOLD
    lead_shape = x.shape[:-1]
    dtype = x.dtype
    itemsize = jnp.dtype(dtype).itemsize

    x2d = x.reshape(-1, in_dim)                    # (M, in_dim)
    m = x2d.shape[0]

    if m == 0:                                     # degenerate empty input
        return jnp.zeros((*lead_shape, out_dim), dtype=dtype)

    # --- fold rows onto the lane axis (row-major reshape). Only pad when ragged.
    aligned = (m % FOLD) == 0
    if aligned:
        rows = m
        x_rows = x2d
    else:
        rows = _round_up(m, FOLD)                  # at most 7 extra rows
        x_rows = jnp.pad(x2d, ((0, rows - m), (0, 0)))
    m_f = rows // FOLD
    x_fold = x_rows.reshape(m_f, FOLD * in_dim)    # (M_f, 8*in_dim) lane-dense

    # --- row-tile selection ----------------------------------------------------
    sub = _sublane_multiple(dtype)
    if m_f > block_rows_folded:
        tm_f = _round_up(block_rows_folded, sub)   # big tile; grid length >= 2
    elif m_f >= 2 * sub:
        # Fits in one tile: split in two so both v7x TensorCores get a tile.
        tm_f = _round_up(pl.cdiv(m_f, 2), sub)
    else:
        tm_f = m_f                                 # tiny input: full-extent block
    grid = (pl.cdiv(m_f, tm_f),)                   # partial last block is masked

    # --- explicit VMEM budget: 2x(in tile + out tile) + resident weight/bias ----
    tile_in_bytes = tm_f * FOLD * in_dim * itemsize
    tile_out_bytes = tm_f * FOLD * out_dim * itemsize
    const_bytes = (w_fold.size * jnp.dtype(w_fold.dtype).itemsize
                   + b_fold.size * jnp.dtype(b_fold.dtype).itemsize)
    needed = 2 * (tile_in_bytes + tile_out_bytes) + const_bytes
    vmem_limit = int(min(max(needed + (2 << 20), 16 << 20), 48 << 20))

    out_fold = pl.pallas_call(
        _folded_linear_kernel,
        out_shape=jax.ShapeDtypeStruct((m_f, FOLD * out_dim), dtype),
        grid_spec=pltpu.PrefetchScalarGridSpec(
            num_scalar_prefetch=0,
            grid=grid,
            in_specs=[
                # x: tiled over folded rows -> pipelined HBM loads
                pl.BlockSpec((tm_f, FOLD * in_dim), lambda i: (i, 0)),
                # weight / bias: same block every step -> stay resident in VMEM
                pl.BlockSpec((FOLD * in_dim, FOLD * out_dim), lambda i: (0, 0)),
                pl.BlockSpec((1, FOLD * out_dim), lambda i: (0, 0)),
            ],
            out_specs=pl.BlockSpec((tm_f, FOLD * out_dim), lambda i: (i, 0)),
        ),
        compiler_params=pltpu.CompilerParams(
            # Row tiles are independent -> shard across both TCs on v7x.
            dimension_semantics=("parallel",),
            vmem_limit_bytes=vmem_limit,
        ),
        cost_estimate=pl.CostEstimate(
            flops=2 * m_f * (FOLD * in_dim) * (FOLD * out_dim),
            transcendentals=0,
            bytes_accessed=(x_fold.size + w_fold.size + b_fold.size
                            + m_f * FOLD * out_dim) * itemsize,
        ),
    )(x_fold, w_fold, b_fold)

    out2d = out_fold.reshape(rows, out_dim)        # free row-major unfold
    if not aligned:
        out2d = out2d[:m]                          # only in the ragged case
    return out2d.reshape(*lead_shape, out_dim)


def downsampler_forward(x, weight, bias, *, block_rows_folded=2048):
    """Convenience wrapper: folds params (prefer fold_linear_params once per weight)."""
    w_fold, b_fold = fold_linear_params(weight, bias)
    return downsampler_forward_folded(
        x, w_fold, b_fold, block_rows_folded=block_rows_folded
    )


if __name__ == "__main__":
    # Small shapes consistent with the module: (batch, num_vertices, in_dim)
    B, N, IN_DIM, OUT_DIM = 2, 8, 32, 16

    key = jax.random.PRNGKey(0)
    k_x, k_w, k_b, k_x2 = jax.random.split(key, 4)

    x = jax.random.normal(k_x, (B, N, IN_DIM), dtype=jnp.float32)

    # Deterministic nn.Linear-style init: U(-1/sqrt(in_dim), 1/sqrt(in_dim))
    bound = 1.0 / (IN_DIM ** 0.5)
    weight = jax.random.uniform(
        k_w, (OUT_DIM, IN_DIM), dtype=jnp.float32, minval=-bound, maxval=bound
    )
    bias = jax.random.uniform(
        k_b, (OUT_DIM,), dtype=jnp.float32, minval=-bound, maxval=bound
    )

    # Hoisted path: fold the weight once, reuse across calls.
    w_fold, b_fold = fold_linear_params(weight, bias)
    fwd = jax.jit(downsampler_forward_folded)

    out = fwd(x, w_fold, b_fold)
    jax.block_until_ready(out)

    ref = x @ weight.T + bias
    assert out.shape == (B, N, OUT_DIM)
    assert jnp.allclose(out, ref, atol=1e-5, rtol=1e-5)

    # Ragged M (3*7=21 rows, not a multiple of FOLD): exercises the small-pad path.
    x_odd = jax.random.normal(k_x2, (3, 7, IN_DIM), dtype=jnp.float32)
    out_odd = downsampler_forward(x_odd, weight, bias)
    jax.block_until_ready(out_odd)
    ref_odd = x_odd @ weight.T + bias
    assert out_odd.shape == (3, 7, OUT_DIM)
    assert jnp.allclose(out_odd, ref_odd, atol=1e-5, rtol=1e-5)

    print("KERNEL_OK")
</pallas_src>

<mosaic_0001>
module attributes {stable_mosaic.version = 11 : i64} {
  func.func @_folded_linear_kernel(%arg0: i32, %arg1: memref<2x256xf32, #tpu.memory_space<vmem>>, %arg2: memref<256x128xf32, #tpu.memory_space<vmem>>, %arg3: memref<1x128xf32, #tpu.memory_space<vmem>>, %arg4: memref<2x128xf32, #tpu.memory_space<vmem>>) attributes {dimension_semantics = [#tpu.dimension_semantics<parallel>], iteration_bounds = array<i64: 1>, scalar_prefetch = 0 : i64, scratch_operands = 0 : i64, tpu.core_type = #tpu.core_type<tc>, window_params = [{transform_indices = @transform_0, window_bounds = array<i64: 2, 256>}, {pipeline_mode = #tpu.pipeline_mode<synchronous>, transform_indices = @transform_1, window_bounds = array<i64: 256, 128>}, {pipeline_mode = #tpu.pipeline_mode<synchronous>, transform_indices = @transform_2, window_bounds = array<i64: 1, 128>}, {transform_indices = @transform_3, window_bounds = array<i64: 2, 128>}]} {
    %c0 = arith.constant 0 : index
    %c0_0 = arith.constant 0 : index
    %0 = vector.load %arg1[%c0, %c0_0] : memref<2x256xf32, #tpu.memory_space<vmem>>, vector<2x256xf32>
    %c0_1 = arith.constant 0 : index
    %c0_2 = arith.constant 0 : index
    %1 = vector.load %arg2[%c0_1, %c0_2] : memref<256x128xf32, #tpu.memory_space<vmem>>, vector<256x128xf32>
    %cst = arith.constant dense<0.000000e+00> : vector<2x128xf32>
    %2 = tpu.matmul %0, %1, %cst {dimension_numbers = #tpu.dot_dimension_numbers<[1], [0], [0], [1], [0, 0, 1, 1], [], []>} : vector<2x256xf32>, vector<256x128xf32>, vector<2x128xf32> -> vector<2x128xf32>
    %c0_3 = arith.constant 0 : index
    %c0_4 = arith.constant 0 : index
    %3 = vector.load %arg3[%c0_3, %c0_4] : memref<1x128xf32, #tpu.memory_space<vmem>>, vector<1x128xf32>
    %4 = vector.broadcast %3 : vector<1x128xf32> to vector<2x128xf32>
    %5 = arith.addf %2, %4 : vector<2x128xf32>
    %c0_5 = arith.constant 0 : index
    %c0_6 = arith.constant 0 : index
    %6 = vector.load %arg4[%c0_5, %c0_6] : memref<2x128xf32, #tpu.memory_space<vmem>>, vector<2x128xf32>
    tpu.vector_store %arg4[%c0_5, %c0_6], %5 {strides = array<i32>} : memref<2x128xf32, #tpu.memory_space<vmem>>, vector<2x128xf32>,
    return
  }
  func.func @transform_0(%arg0: i32) -> (i32, i32) {
    %c0_i32 = arith.constant 0 : i32
    %c0_i32_0 = arith.constant 0 : i32
    return %arg0, %c0_i32 : i32, i32
  }
  func.func @transform_1(%arg0: i32) -> (i32, i32) {
    %c0_i32 = arith.constant 0 : i32
    %c0_i32_0 = arith.constant 0 : i32
    %c0_i32_1 = arith.constant 0 : i32
    return %c0_i32, %c0_i32_0 : i32, i32
  }
  func.func @transform_2(%arg0: i32) -> (i32, i32) {
    %c0_i32 = arith.constant 0 : i32
    %c0_i32_0 = arith.constant 0 : i32
    %c0_i32_1 = arith.constant 0 : i32
    return %c0_i32, %c0_i32_0 : i32, i32
  }
  func.func @transform_3(%arg0: i32) -> (i32, i32) {
    %c0_i32 = arith.constant 0 : i32
    %c0_i32_0 = arith.constant 0 : i32
    return %arg0, %c0_i32 : i32, i32
  }
}

</mosaic_0001>

<bundles_post_ra>
// kernel: downsampler_forward_folded.1
= control target key start
LH: loop header
LB: loop body
LE: loop exit
PB: predicated region body
PF: predicated region fallthrough
CT: control target
= control target key end

     0   :  { %8 = vsyncpa [#allocation3], 0  ;;  %s251_s12 = smov [#allocation2]   ;;  %s295_s0 = inlined_call_operand.vmem [shape: f32[2,256], index: 0, kind: input, shape index: {}]   ;;  %s296_s1 = inlined_call_operand.hbm [shape: f32[256,128], index: 1, kind: input, shape index: {}]   ;;  %s297_s2 = inlined_call_operand.vmem [shape: f32[1,128], index: 2, kind: input, shape index: {}]   ;;  %s298_s3 = inlined_call_operand.vmem [shape: f32[2,128], index: 3, kind: output, shape index: {}]  }
   0x1   :  { %s16_s13 = sshll.u32 %s251_s12, 4  ;;  %s227_s16 = scalar_lea.hbm %s296_s1, 4096  ;;  %s17_s13 = int_to_ptr.vmem [resolvable:$true] %s16_s13 }
   0x2   :  { %p228_p0 = scmp.ne.s32.totalorder %s296_s1, %s227_s16  ;;  %p231_p1 = scmp.lt.u32.totalorder %s227_s16, %s296_s1 }
   0x4   :  { %p233_p2 = pnand %p231_p1, %p228_p0 }
   0x6   :  { %236 = shalt.err (!%p233_p2)
}
   0x7   :  { %s237_s21 = scalar_lea.vmem %s17_s13, 4096  ;;  %p242_p4 = scmp.lt.s32.totalorder %s17_s13, %s17_s13 }
   0x8   :  { %p238_p3 = scmp.ne.s32.totalorder %s17_s13, %s237_s21  ;;  %p243_p5 = scmp.lt.s32.totalorder %s237_s21, %s237_s21 }
   0xa   :  { %p244_p6 = por %p243_p5, %p242_p4 }
   0xc   :  { %p245_p7 = pnand %p244_p6, %p238_p3 }
   0xe   :  { %248 = shalt.err (!%p245_p7)
}
   0xf   :  { %s252_s22 = smov 128   ;;  %s253_s23 = smov 8  }
  0x10   :  { %22 = dma.hbm_to_vmem [thread:$0]  %s296_s1, 4096, %s17_s13, [#allocation3], %s252_s22, %s252_s22, %s253_s23  }
  0x11   :  { %249 = dma.done.wait [#allocation3], 4096  }
  0x12   :  { %250 = vsyncadd [#allocation3], 4294963200  ;;  %v45_v0 = vld [vmem:[#allocation2 + $0x80] sm:$0xff]  ;;  %v46_v1 = vld [vmem:[#allocation2 + $0x88] sm:$0xff] }
  0x13   :  { %v29_v2 = vld [vmem:[#allocation2] sm:$0xff]  ;;  %v192_v3 = vpack.c.bf16 %v46_v1, %v45_v0  ;;  %v30_v4 = vld [vmem:[#allocation2 + $0x8] sm:$0xff]  ;;  %v47_v5 = vld [vmem:[#allocation2 + $0x90] sm:$0xff] }
  0x14   :  { %v48_v6 = vld [vmem:[#allocation2 + $0x98] sm:$0xff]  ;;  %v194_v7 = vpack.c.bf16 %v30_v4, %v29_v2  ;;  %v31_v9 = vld [vmem:[#allocation2 + $0x10] sm:$0xff]  ;;  %v49_v11 = vld [vmem:[#allocation2 + $0xa0] sm:$0xff] }
  0x15   :  { %v196_v8 = vpack.c.bf16 %v48_v6, %v47_v5  ;;  %v32_v10 = vld [vmem:[#allocation2 + $0x18] sm:$0xff]  ;;  %193 = vmatprep.subr.bf16.mxu0 %v192_v3  ;;  %v50_v12 = vld [vmem:[#allocation2 + $0xa8] sm:$0xff]  ;;  %v33_v15 = vld [vmem:[#allocation2 + $0x20] sm:$0xff] }
  0x16   :  { %195 = vmatpush3.bf16.msra.mxu0 %v194_v7  ;;  %v198_v13 = vpack.c.bf16 %v32_v10, %v31_v9  ;;  %v200_v14 = vpack.c.bf16 %v50_v12, %v49_v11  ;;  %v34_v16 = vld [vmem:[#allocation2 + $0x28] sm:$0xff]  ;;  %v51_v17 = vld [vmem:[#allocation2 + $0xb0] sm:$0xff]  ;;  %v52_v18 = vld [vmem:[#allocation2 + $0xb8] sm:$0xff] }
  0x17   :  { %197 = vmatprep.subr.bf16.mxu0 %v196_v8  ;;  %v202_v19 = vpack.c.bf16 %v34_v16, %v33_v15  ;;  %v204_v20 = vpack.c.bf16 %v52_v18, %v51_v17  ;;  %v35_v21 = vld [vmem:[#allocation2 + $0x30] sm:$0xff]  ;;  %v36_v22 = vld [vmem:[#allocation2 + $0x38] sm:$0xff]  ;;  %v53_v23 = vld [vmem:[#allocation2 + $0xc0] sm:$0xff] }
  0x18   :  { %v54_v24 = vld [vmem:[#allocation2 + $0xc8] sm:$0xff]  ;;  %v156_v25 = vld.sshfl [vmem:[%s295_s0] sm:$0x33 pattern:$0x76325410]  ;;  %v206_v27 = vpack.c.bf16 %v36_v22, %v35_v21  ;;  %v55_v31 = vld [vmem:[#allocation2 + $0xd0] sm:$0xff] }
  0x19   :  { %v76_v26 = vcombine.high %v156_v25, %v156_v25  ;;  %v208_v28 = vpack.c.bf16 %v54_v24, %v53_v23  ;;  %v37_v29 = vld [vmem:[#allocation2 + $0x40] sm:$0xff]  ;;  %v38_v30 = vld [vmem:[#allocation2 + $0x48] sm:$0xff]  ;;  %v56_v32 = vld [vmem:[#allocation2 + $0xd8] sm:$0xff] }
  0x1a   :  { %199 = vmatpush3.bf16.msra.mxu0 %v198_v13  ;;  %v210_v33 = vpack.c.bf16 %v38_v30, %v37_v29  ;;  %v212_v34 = vpack.c.bf16 %v56_v32, %v55_v31  ;;  %v39_v35 = vld [vmem:[#allocation2 + $0x50] sm:$0xff]  ;;  %v40_v36 = vld [vmem:[#allocation2 + $0x58] sm:$0xff]  ;;  %v57_v37 = vld [vmem:[#allocation2 + $0xe0] sm:$0xff] }
  0x1b   :  { %201 = vmatprep.subr.bf16.mxu0 %v200_v14  ;;  %143 = vmatprep.mubr.f32.mxu0 %v76_v26  ;;  %v58_v38 = vld [vmem:[#allocation2 + $0xe8] sm:$0xff]  ;;  %v214_v39 = vpack.c.bf16 %v40_v36, %v39_v35  ;;  %v41_v41 = vld [vmem:[#allocation2 + $0x60] sm:$0xff]  ;;  %v59_v43 = vld [vmem:[#allocation2 + $0xf0] sm:$0xff] }
  0x1c   :  { %v216_v40 = vpack.c.bf16 %v58_v38, %v57_v37  ;;  %v42_v42 = vld [vmem:[#allocation2 + $0x68] sm:$0xff]  ;;  %v60_v44 = vld [vmem:[#allocation2 + $0xf8] sm:$0xff]  ;;  %v43_v47 = vld [vmem:[#allocation2 + $0x70] sm:$0xff] }
  0x1d   :  { %v218_v45 = vpack.c.bf16 %v42_v42, %v41_v41  ;;  %v220_v46 = vpack.c.bf16 %v60_v44, %v59_v43  ;;  %v44_v48 = vld [vmem:[#allocation2 + $0x78] sm:$0xff]  ;;  %v155_v51 = vld [vmem:[%s297_s2] ss:$0 sm:$0xff] }
  0x1e   :  { %203 = vmatpush3.bf16.msra.mxu0 %v202_v19  ;;  %v222_v49 = vpack.c.bf16 %v44_v48, %v43_v47 }
  0x1f   :  { %205 = vmatprep.subr.bf16.mxu0 %v204_v20 }
  0x22   :  { %207 = vmatpush3.bf16.msra.mxu0 %v206_v27 }
  0x23   :  { %209 = vmatprep.subr.bf16.mxu0 %v208_v28 }
  0x26   :  { %211 = vmatpush3.bf16.msra.mxu0 %v210_v33 }
  0x27   :  { %213 = vmatprep.subr.bf16.mxu0 %v212_v34 }
  0x2a   :  { %215 = vmatpush3.bf16.msra.mxu0 %v214_v39 }
  0x2b   :  { %217 = vmatprep.subr.bf16.mxu0 %v216_v40 }
  0x2e   :  { %219 = vmatpush3.bf16.msra.mxu0 %v218_v45 }
  0x2f   :  { %221 = vmatprep.subr.bf16.mxu0 %v220_v46 }
  0x32   :  { %223 = vmatpush3.bf16.msra.mxu0 %v222_v49 }
  0x35   :  { %144 = vmatmul.mubr.f32.vlgmr.msra.gmra.mrb[0].mxu0 %v156_v25 }
 0x108   :  { %v189_v50 = vpop.f32.mrb[0].mxu0 }
 0x109   :  { %v190_v52 = vpop.f32.mrb[1].mxu0 }
 0x10a   :  { %v191_v53 = vadd.f32 %v190_v52, %v189_v50 }
 0x10c   :  { %v146_v54 = vadd.f32 %v191_v53, %v155_v51 }
 0x10e   :  { %149 = vst [vmem:[%s298_s3] sm:$0x3] %v146_v54 }
 0x10f   :  { %154 = vsyncpa [#allocation3], 1 }

</bundles_post_ra>
